<compile_context>
chip_gen: v7x
topology: tpu7x:2x2x1
jax: 0.10.0
libtpu: 0.0.40
codegen_flags: <defaults>
</compile_context>

<pallas_src>
import functools
import math

import jax
import jax.numpy as jnp
import numpy as np
from jax.experimental import pallas as pl
from jax.experimental.pallas import tpu as pltpu

_INV_SQRT2 = 0.7071067811865476


def _gelu(x):
    # nn.GELU() default is the exact (erf) variant; keep it in f32.
    return 0.5 * x * (1.0 + jax.lax.erf(x * _INV_SQRT2))


def _dot_bf16(x_f32, w_bf16):
    # bf16 operands, f32 accumulation on the MXU.
    return jnp.dot(x_f32.astype(jnp.bfloat16), w_bf16,
                   preferred_element_type=jnp.float32)


def _sort_rows_network(bt):
    """Ascending sort across the J sublane-rows of bt (J, TB).

    Odd-even transposition sorting network: J passes of adjacent
    compare-exchanges (provably sorts any length-J sequence).  Every
    compare-exchange is a lane-dense VPU min/max on a (1, TB) row; no
    (TB, J, J) intermediates, no cross-lane reductions.
    """
    J = bt.shape[0]
    rows = [bt[j:j + 1, :] for j in range(J)]          # J x (1, TB)
    for p in range(J):
        for i in range(p % 2, J - 1, 2):
            lo = jnp.minimum(rows[i], rows[i + 1])
            hi = jnp.maximum(rows[i], rows[i + 1])
            rows[i], rows[i + 1] = lo, hi
    return jnp.concatenate(rows, axis=0)               # (J, TB), ascending


def mlp_sort_kernel(y_ref, win_ref, bin_ref, w1_ref, b1_ref, w2_ref, b2_ref,
                    wout_ref, bout_ref, out_ref):
    # ---- MLP hot path: bf16 MXU matmuls (f32 accumulation), f32 bias+GELU --
    h = _gelu(jnp.dot(y_ref[...], win_ref[...],
                      preferred_element_type=jnp.float32) + bin_ref[...])
    h = _gelu(_dot_bf16(h, w1_ref[...]) + b1_ref[...])
    h = _gelu(_dot_bf16(h, w2_ref[...]) + b2_ref[...])
    beta = _dot_bf16(h, wout_ref[...]) + bout_ref[...]          # (TB, J) f32

    # ---- ascending sort along J (torch.sort values) ------------------------
    # Transpose to (J, TB): J=8 sublanes x TB lanes, fully lane-dense, and the
    # output block is stored transposed as well (unmasked lane-dense stores).
    bt = jnp.transpose(beta)                                    # (J, TB)
    out_ref[...] = _sort_rows_network(bt).astype(out_ref.dtype)


def _round_up(x, m):
    return ((x + m - 1) // m) * m


@functools.partial(jax.jit, static_argnames=("tb",))
def model_forward(y, params, *, tb=1024):
    """params = (Win, bin, W1, b1, W2, b2, Wout, bout); weights stored
    pre-transposed as (in_features, out_features), biases as (1, out)."""
    win, bin_, w1, b1, w2, b2, wout, bout = params
    B, n = y.shape
    nh = win.shape[1]
    J = wout.shape[1]

    # ---- batch tiling ------------------------------------------------------
    # Large tiles amortize the per-grid-step fixed overhead; balanced tiling
    # avoids pathological padding; keep >=2 steps for big batches so the
    # "parallel" axis can shard across v7x's two TensorCores.
    nsteps = max(1, math.ceil(B / int(tb)))
    if nsteps == 1 and B >= 1024:
        nsteps = 2
    if nsteps == 1:
        TB = max(8, _round_up(B, 8))
    else:
        # Multi-step: the lane-dense (J, TB) output block needs TB % 128 == 0.
        TB = _round_up(math.ceil(B / nsteps), 128)
    Bp = TB * nsteps

    # ---- inputs: bf16 streamed activations, bf16 resident weights ----------
    bf = jnp.bfloat16
    y_p = jnp.pad(y, ((0, Bp - B), (0, 0))) if Bp != B else y
    inputs = (y_p.astype(bf), win.astype(bf), bin_, w1.astype(bf), b1,
              w2.astype(bf), b2, wout.astype(bf), bout)

    def resident(a):  # whole array, DMA'd once, VMEM-resident across steps
        return pl.BlockSpec(a.shape, lambda i: (0, 0))

    in_specs = ([pl.BlockSpec((TB, n), lambda i: (i, 0))]
                + [resident(a) for a in inputs[1:]])
    # Output is produced transposed, (J, Bp): unmasked lane-dense stores.
    out_specs = pl.BlockSpec((J, TB), lambda i: (0, i))

    flops = 2 * Bp * (n * nh + 2 * nh * nh + nh * J) + 2 * Bp * J * J
    bytes_accessed = (int(inputs[0].size) * 2 + Bp * J * 4
                      + sum(int(a.size) * a.dtype.itemsize
                            for a in inputs[1:]))

    out_t = pl.pallas_call(
        mlp_sort_kernel,
        out_shape=jax.ShapeDtypeStruct((J, Bp), jnp.float32),
        grid=(Bp // TB,),
        in_specs=in_specs,
        out_specs=out_specs,
        compiler_params=pltpu.CompilerParams(
            dimension_semantics=("parallel",)),
        cost_estimate=pl.CostEstimate(
            flops=int(flops),
            transcendentals=int(3 * Bp * nh),
            bytes_accessed=int(bytes_accessed)),
    )(*inputs)

    out = out_t.T                           # (Bp, J), ascending along last dim
    return out[:B] if Bp != B else out


def init_params(key, n, nhidden, J, depth=2):
    """PyTorch-Linear-style init (uniform +-1/sqrt(fan_in)); weights returned
    pre-transposed to (in_features, out_features), biases as (1, out)."""
    def linear(k, fan_in, fan_out):
        kw, kb = jax.random.split(k)
        bound = 1.0 / np.sqrt(fan_in)
        w = jax.random.uniform(kw, (fan_in, fan_out), jnp.float32, -bound, bound)
        b = jax.random.uniform(kb, (1, fan_out), jnp.float32, -bound, bound)
        return w, b

    keys = jax.random.split(key, depth + 2)
    win, bin_ = linear(keys[0], n, nhidden)
    hidden = [linear(keys[1 + i], nhidden, nhidden) for i in range(depth)]
    wout, bout = linear(keys[-1], nhidden, J)
    flat = [win, bin_]
    for w, b in hidden:
        flat += [w, b]
    flat += [wout, bout]
    return tuple(flat)


def reference_forward(y, params):
    # Mirrors the kernel numerics (bf16 matmul operands, f32 accumulation) so
    # the comparison is tight; semantics match the PyTorch module.
    win, bin_, w1, b1, w2, b2, wout, bout = params

    def lin(x, w, b):
        return jnp.dot(x.astype(jnp.bfloat16), w.astype(jnp.bfloat16),
                       preferred_element_type=jnp.float32) + b

    h = _gelu(lin(y, win, bin_))
    h = _gelu(lin(h, w1, b1))
    h = _gelu(lin(h, w2, b2))
    beta = lin(h, wout, bout)
    return jnp.sort(beta, axis=-1)


if __name__ == "__main__":
    # Small shapes consistent with the module: batch=8, n=16, nhidden=32, J=8.
    B, n, nhidden, J, depth = 8, 16, 32, 8, 2

    key = jax.random.PRNGKey(0)
    k_in, k_params = jax.random.split(key)
    y = jax.random.normal(k_in, (B, n), dtype=jnp.float32)
    params = init_params(k_params, n, nhidden, J, depth=depth)

    out = jax.block_until_ready(model_forward(y, params))
    ref = jax.block_until_ready(reference_forward(y, params))

    np.testing.assert_allclose(np.asarray(out), np.asarray(ref),
                               rtol=5e-3, atol=5e-3)
    print("KERNEL_OK")
</pallas_src>

<mosaic_0001>
module attributes {stable_mosaic.version = 11 : i64} {
  func.func @mlp_sort_kernel(%arg0: i32, %arg1: memref<8x16xbf16, #tpu.memory_space<vmem>>, %arg2: memref<16x32xbf16, #tpu.memory_space<vmem>>, %arg3: memref<1x32xf32, #tpu.memory_space<vmem>>, %arg4: memref<32x32xbf16, #tpu.memory_space<vmem>>, %arg5: memref<1x32xf32, #tpu.memory_space<vmem>>, %arg6: memref<32x32xbf16, #tpu.memory_space<vmem>>, %arg7: memref<1x32xf32, #tpu.memory_space<vmem>>, %arg8: memref<32x8xbf16, #tpu.memory_space<vmem>>, %arg9: memref<1x8xf32, #tpu.memory_space<vmem>>, %arg10: memref<8x8xf32, #tpu.memory_space<vmem>>) attributes {dimension_semantics = [#tpu.dimension_semantics<parallel>], iteration_bounds = array<i64: 1>, scalar_prefetch = 0 : i64, scratch_operands = 0 : i64, tpu.core_type = #tpu.core_type<tc>, window_params = [{transform_indices = @transform_0, window_bounds = array<i64: 8, 16>}, {pipeline_mode = #tpu.pipeline_mode<synchronous>, transform_indices = @transform_1, window_bounds = array<i64: 16, 32>}, {pipeline_mode = #tpu.pipeline_mode<synchronous>, transform_indices = @transform_2, window_bounds = array<i64: 1, 32>}, {pipeline_mode = #tpu.pipeline_mode<synchronous>, transform_indices = @transform_3, window_bounds = array<i64: 32, 32>}, {pipeline_mode = #tpu.pipeline_mode<synchronous>, transform_indices = @transform_4, window_bounds = array<i64: 1, 32>}, {pipeline_mode = #tpu.pipeline_mode<synchronous>, transform_indices = @transform_5, window_bounds = array<i64: 32, 32>}, {pipeline_mode = #tpu.pipeline_mode<synchronous>, transform_indices = @transform_6, window_bounds = array<i64: 1, 32>}, {pipeline_mode = #tpu.pipeline_mode<synchronous>, transform_indices = @transform_7, window_bounds = array<i64: 32, 8>}, {pipeline_mode = #tpu.pipeline_mode<synchronous>, transform_indices = @transform_8, window_bounds = array<i64: 1, 8>}, {transform_indices = @transform_9, window_bounds = array<i64: 8, 8>}]} {
    %c0 = arith.constant 0 : index
    %c0_0 = arith.constant 0 : index
    %0 = vector.load %arg1[%c0, %c0_0] : memref<8x16xbf16, #tpu.memory_space<vmem>>, vector<8x16xbf16>
    %c0_1 = arith.constant 0 : index
    %c0_2 = arith.constant 0 : index
    %1 = vector.load %arg2[%c0_1, %c0_2] : memref<16x32xbf16, #tpu.memory_space<vmem>>, vector<16x32xbf16>
    %cst = arith.constant dense<0.000000e+00> : vector<8x32xf32>
    %2 = tpu.matmul %0, %1, %cst {dimension_numbers = #tpu.dot_dimension_numbers<[1], [0], [0], [1], [0, 0, 1, 1], [], []>} : vector<8x16xbf16>, vector<16x32xbf16>, vector<8x32xf32> -> vector<8x32xf32>
    %c0_3 = arith.constant 0 : index
    %c0_4 = arith.constant 0 : index
    %3 = vector.load %arg3[%c0_3, %c0_4] : memref<1x32xf32, #tpu.memory_space<vmem>>, vector<1x32xf32>
    %4 = vector.broadcast %3 : vector<1x32xf32> to vector<8x32xf32>
    %5 = arith.addf %2, %4 : vector<8x32xf32>
    %cst_5 = arith.constant 5.000000e-01 : f32
    %6 = vector.broadcast %cst_5 : f32 to vector<8x32xf32>
    %7 = arith.mulf %6, %5 : vector<8x32xf32>
    %cst_6 = arith.constant 0.707106769 : f32
    %8 = vector.broadcast %cst_6 : f32 to vector<8x32xf32>
    %9 = arith.mulf %5, %8 : vector<8x32xf32>
    %10 = math.erf %9 : vector<8x32xf32>
    %cst_7 = arith.constant 1.000000e+00 : f32
    %11 = vector.broadcast %cst_7 : f32 to vector<8x32xf32>
    %12 = arith.addf %11, %10 : vector<8x32xf32>
    %13 = arith.mulf %7, %12 : vector<8x32xf32>
    %c0_8 = arith.constant 0 : index
    %c0_9 = arith.constant 0 : index
    %14 = vector.load %arg4[%c0_8, %c0_9] : memref<32x32xbf16, #tpu.memory_space<vmem>>, vector<32x32xbf16>
    %15 = arith.truncf %13 : vector<8x32xf32> to vector<8x32xbf16>
    %cst_10 = arith.constant dense<0.000000e+00> : vector<8x32xf32>
    %16 = tpu.matmul %15, %14, %cst_10 {dimension_numbers = #tpu.dot_dimension_numbers<[1], [0], [0], [1], [0, 0, 1, 1], [], []>} : vector<8x32xbf16>, vector<32x32xbf16>, vector<8x32xf32> -> vector<8x32xf32>
    %c0_11 = arith.constant 0 : index
    %c0_12 = arith.constant 0 : index
    %17 = vector.load %arg5[%c0_11, %c0_12] : memref<1x32xf32, #tpu.memory_space<vmem>>, vector<1x32xf32>
    %18 = vector.broadcast %17 : vector<1x32xf32> to vector<8x32xf32>
    %19 = arith.addf %16, %18 : vector<8x32xf32>
    %cst_13 = arith.constant 5.000000e-01 : f32
    %20 = vector.broadcast %cst_13 : f32 to vector<8x32xf32>
    %21 = arith.mulf %20, %19 : vector<8x32xf32>
    %cst_14 = arith.constant 0.707106769 : f32
    %22 = vector.broadcast %cst_14 : f32 to vector<8x32xf32>
    %23 = arith.mulf %19, %22 : vector<8x32xf32>
    %24 = math.erf %23 : vector<8x32xf32>
    %cst_15 = arith.constant 1.000000e+00 : f32
    %25 = vector.broadcast %cst_15 : f32 to vector<8x32xf32>
    %26 = arith.addf %25, %24 : vector<8x32xf32>
    %27 = arith.mulf %21, %26 : vector<8x32xf32>
    %c0_16 = arith.constant 0 : index
    %c0_17 = arith.constant 0 : index
    %28 = vector.load %arg6[%c0_16, %c0_17] : memref<32x32xbf16, #tpu.memory_space<vmem>>, vector<32x32xbf16>
    %29 = arith.truncf %27 : vector<8x32xf32> to vector<8x32xbf16>
    %cst_18 = arith.constant dense<0.000000e+00> : vector<8x32xf32>
    %30 = tpu.matmul %29, %28, %cst_18 {dimension_numbers = #tpu.dot_dimension_numbers<[1], [0], [0], [1], [0, 0, 1, 1], [], []>} : vector<8x32xbf16>, vector<32x32xbf16>, vector<8x32xf32> -> vector<8x32xf32>
    %c0_19 = arith.constant 0 : index
    %c0_20 = arith.constant 0 : index
    %31 = vector.load %arg7[%c0_19, %c0_20] : memref<1x32xf32, #tpu.memory_space<vmem>>, vector<1x32xf32>
    %32 = vector.broadcast %31 : vector<1x32xf32> to vector<8x32xf32>
    %33 = arith.addf %30, %32 : vector<8x32xf32>
    %cst_21 = arith.constant 5.000000e-01 : f32
    %34 = vector.broadcast %cst_21 : f32 to vector<8x32xf32>
    %35 = arith.mulf %34, %33 : vector<8x32xf32>
    %cst_22 = arith.constant 0.707106769 : f32
    %36 = vector.broadcast %cst_22 : f32 to vector<8x32xf32>
    %37 = arith.mulf %33, %36 : vector<8x32xf32>
    %38 = math.erf %37 : vector<8x32xf32>
    %cst_23 = arith.constant 1.000000e+00 : f32
    %39 = vector.broadcast %cst_23 : f32 to vector<8x32xf32>
    %40 = arith.addf %39, %38 : vector<8x32xf32>
    %41 = arith.mulf %35, %40 : vector<8x32xf32>
    %c0_24 = arith.constant 0 : index
    %c0_25 = arith.constant 0 : index
    %42 = vector.load %arg8[%c0_24, %c0_25] : memref<32x8xbf16, #tpu.memory_space<vmem>>, vector<32x8xbf16>
    %43 = arith.truncf %41 : vector<8x32xf32> to vector<8x32xbf16>
    %cst_26 = arith.constant dense<0.000000e+00> : vector<8x8xf32>
    %44 = tpu.matmul %43, %42, %cst_26 {dimension_numbers = #tpu.dot_dimension_numbers<[1], [0], [0], [1], [0, 0, 1, 1], [], []>} : vector<8x32xbf16>, vector<32x8xbf16>, vector<8x8xf32> -> vector<8x8xf32>
    %c0_27 = arith.constant 0 : index
    %c0_28 = arith.constant 0 : index
    %45 = vector.load %arg9[%c0_27, %c0_28] : memref<1x8xf32, #tpu.memory_space<vmem>>, vector<1x8xf32>
    %46 = vector.broadcast %45 : vector<1x8xf32> to vector<8x8xf32>
    %47 = arith.addf %44, %46 : vector<8x8xf32>
    %48 = tpu.transpose %47, [1, 0] : vector<8x8xf32> -> vector<8x8xf32>
    %49 = vector.extract_strided_slice %48 {offsets = [0, 0], sizes = [1, 8], strides = [1, 1]} : vector<8x8xf32> to vector<1x8xf32>
    %50 = vector.extract_strided_slice %48 {offsets = [1, 0], sizes = [1, 8], strides = [1, 1]} : vector<8x8xf32> to vector<1x8xf32>
    %51 = vector.extract_strided_slice %48 {offsets = [2, 0], sizes = [1, 8], strides = [1, 1]} : vector<8x8xf32> to vector<1x8xf32>
    %52 = vector.extract_strided_slice %48 {offsets = [3, 0], sizes = [1, 8], strides = [1, 1]} : vector<8x8xf32> to vector<1x8xf32>
    %53 = vector.extract_strided_slice %48 {offsets = [4, 0], sizes = [1, 8], strides = [1, 1]} : vector<8x8xf32> to vector<1x8xf32>
    %54 = vector.extract_strided_slice %48 {offsets = [5, 0], sizes = [1, 8], strides = [1, 1]} : vector<8x8xf32> to vector<1x8xf32>
    %55 = vector.extract_strided_slice %48 {offsets = [6, 0], sizes = [1, 8], strides = [1, 1]} : vector<8x8xf32> to vector<1x8xf32>
    %56 = vector.extract_strided_slice %48 {offsets = [7, 0], sizes = [1, 8], strides = [1, 1]} : vector<8x8xf32> to vector<1x8xf32>
    %57 = arith.minimumf %49, %50 : vector<1x8xf32>
    %58 = arith.maximumf %49, %50 : vector<1x8xf32>
    %59 = arith.minimumf %51, %52 : vector<1x8xf32>
    %60 = arith.maximumf %51, %52 : vector<1x8xf32>
    %61 = arith.minimumf %53, %54 : vector<1x8xf32>
    %62 = arith.maximumf %53, %54 : vector<1x8xf32>
    %63 = arith.minimumf %55, %56 : vector<1x8xf32>
    %64 = arith.maximumf %55, %56 : vector<1x8xf32>
    %65 = arith.minimumf %58, %59 : vector<1x8xf32>
    %66 = arith.maximumf %58, %59 : vector<1x8xf32>
    %67 = arith.minimumf %60, %61 : vector<1x8xf32>
    %68 = arith.maximumf %60, %61 : vector<1x8xf32>
    %69 = arith.minimumf %62, %63 : vector<1x8xf32>
    %70 = arith.maximumf %62, %63 : vector<1x8xf32>
    %71 = arith.minimumf %57, %65 : vector<1x8xf32>
    %72 = arith.maximumf %57, %65 : vector<1x8xf32>
    %73 = arith.minimumf %66, %67 : vector<1x8xf32>
    %74 = arith.maximumf %66, %67 : vector<1x8xf32>
    %75 = arith.minimumf %68, %69 : vector<1x8xf32>
    %76 = arith.maximumf %68, %69 : vector<1x8xf32>
    %77 = arith.minimumf %70, %64 : vector<1x8xf32>
    %78 = arith.maximumf %70, %64 : vector<1x8xf32>
    %79 = arith.minimumf %72, %73 : vector<1x8xf32>
    %80 = arith.maximumf %72, %73 : vector<1x8xf32>
    %81 = arith.minimumf %74, %75 : vector<1x8xf32>
    %82 = arith.maximumf %74, %75 : vector<1x8xf32>
    %83 = arith.minimumf %76, %77 : vector<1x8xf32>
    %84 = arith.maximumf %76, %77 : vector<1x8xf32>
    %85 = arith.minimumf %71, %79 : vector<1x8xf32>
    %86 = arith.maximumf %71, %79 : vector<1x8xf32>
    %87 = arith.minimumf %80, %81 : vector<1x8xf32>
    %88 = arith.maximumf %80, %81 : vector<1x8xf32>
    %89 = arith.minimumf %82, %83 : vector<1x8xf32>
    %90 = arith.maximumf %82, %83 : vector<1x8xf32>
    %91 = arith.minimumf %84, %78 : vector<1x8xf32>
    %92 = arith.maximumf %84, %78 : vector<1x8xf32>
    %93 = arith.minimumf %86, %87 : vector<1x8xf32>
    %94 = arith.maximumf %86, %87 : vector<1x8xf32>
    %95 = arith.minimumf %88, %89 : vector<1x8xf32>
    %96 = arith.maximumf %88, %89 : vector<1x8xf32>
    %97 = arith.minimumf %90, %91 : vector<1x8xf32>
    %98 = arith.maximumf %90, %91 : vector<1x8xf32>
    %99 = arith.minimumf %85, %93 : vector<1x8xf32>
    %100 = arith.maximumf %85, %93 : vector<1x8xf32>
    %101 = arith.minimumf %94, %95 : vector<1x8xf32>
    %102 = arith.maximumf %94, %95 : vector<1x8xf32>
    %103 = arith.minimumf %96, %97 : vector<1x8xf32>
    %104 = arith.maximumf %96, %97 : vector<1x8xf32>
    %105 = arith.minimumf %98, %92 : vector<1x8xf32>
    %106 = arith.maximumf %98, %92 : vector<1x8xf32>
    %107 = arith.minimumf %100, %101 : vector<1x8xf32>
    %108 = arith.maximumf %100, %101 : vector<1x8xf32>
    %109 = arith.minimumf %102, %103 : vector<1x8xf32>
    %110 = arith.maximumf %102, %103 : vector<1x8xf32>
    %111 = arith.minimumf %104, %105 : vector<1x8xf32>
    %112 = arith.maximumf %104, %105 : vector<1x8xf32>
    %113 = tpu.concatenate %99, %107, %108, %109, %110, %111, %112, %106 in 0 : vector<1x8xf32>, vector<1x8xf32>, vector<1x8xf32>, vector<1x8xf32>, vector<1x8xf32>, vector<1x8xf32>, vector<1x8xf32>, vector<1x8xf32> -> vector<8x8xf32>
    %c0_29 = arith.constant 0 : index
    %c0_30 = arith.constant 0 : index
    %114 = vector.load %arg10[%c0_29, %c0_30] : memref<8x8xf32, #tpu.memory_space<vmem>>, vector<8x8xf32>
    tpu.vector_store %arg10[%c0_29, %c0_30], %113 {strides = array<i32>} : memref<8x8xf32, #tpu.memory_space<vmem>>, vector<8x8xf32>,
    return
  }
  func.func @transform_0(%arg0: i32) -> (i32, i32) {
    %c0_i32 = arith.constant 0 : i32
    %c0_i32_0 = arith.constant 0 : i32
    return %arg0, %c0_i32 : i32, i32
  }
  func.func @transform_1(%arg0: i32) -> (i32, i32) {
    %c0_i32 = arith.constant 0 : i32
    %c0_i32_0 = arith.constant 0 : i32
    %c0_i32_1 = arith.constant 0 : i32
    return %c0_i32, %c0_i32_0 : i32, i32
  }
  func.func @transform_2(%arg0: i32) -> (i32, i32) {
    %c0_i32 = arith.constant 0 : i32
    %c0_i32_0 = arith.constant 0 : i32
    %c0_i32_1 = arith.constant 0 : i32
    return %c0_i32, %c0_i32_0 : i32, i32
  }
  func.func @transform_3(%arg0: i32) -> (i32, i32) {
    %c0_i32 = arith.constant 0 : i32
    %c0_i32_0 = arith.constant 0 : i32
    %c0_i32_1 = arith.constant 0 : i32
    return %c0_i32, %c0_i32_0 : i32, i32
  }
  func.func @transform_4(%arg0: i32) -> (i32, i32) {
    %c0_i32 = arith.constant 0 : i32
    %c0_i32_0 = arith.constant 0 : i32
    %c0_i32_1 = arith.constant 0 : i32
    return %c0_i32, %c0_i32_0 : i32, i32
  }
  func.func @transform_5(%arg0: i32) -> (i32, i32) {
    %c0_i32 = arith.constant 0 : i32
    %c0_i32_0 = arith.constant 0 : i32
    %c0_i32_1 = arith.constant 0 : i32
    return %c0_i32, %c0_i32_0 : i32, i32
  }
  func.func @transform_6(%arg0: i32) -> (i32, i32) {
    %c0_i32 = arith.constant 0 : i32
    %c0_i32_0 = arith.constant 0 : i32
    %c0_i32_1 = arith.constant 0 : i32
    return %c0_i32, %c0_i32_0 : i32, i32
  }
  func.func @transform_7(%arg0: i32) -> (i32, i32) {
    %c0_i32 = arith.constant 0 : i32
    %c0_i32_0 = arith.constant 0 : i32
    %c0_i32_1 = arith.constant 0 : i32
    return %c0_i32, %c0_i32_0 : i32, i32
  }
  func.func @transform_8(%arg0: i32) -> (i32, i32) {
    %c0_i32 = arith.constant 0 : i32
    %c0_i32_0 = arith.constant 0 : i32
    %c0_i32_1 = arith.constant 0 : i32
    return %c0_i32, %c0_i32_0 : i32, i32
  }
  func.func @transform_9(%arg0: i32) -> (i32, i32) {
    %c0_i32 = arith.constant 0 : i32
    %c0_i32_0 = arith.constant 0 : i32
    return %c0_i32, %arg0 : i32, i32
  }
}

</mosaic_0001>

<bundles_post_ra>
// kernel: model_forward.1
= control target key start
LH: loop header
LB: loop body
LE: loop exit
PB: predicated region body
PF: predicated region fallthrough
CT: control target
= control target key end

     0   :  { %v528_v0 = vmov 0.0   ;;  %vm529_vm0 = vmmov 0   ;;  %vm49_vm1 = vcmask 130048   ;;  %vm122_vm2 = vcmask 261120   ;;  %s626_s1 = inlined_call_operand.vmem [shape: bf16[16,32], index: 1, kind: input, shape index: {}]   ;;  %s627_s0 = inlined_call_operand.vmem [shape: bf16[8,16], index: 0, kind: input, shape index: {}]   ;;  %s628_s3 = inlined_call_operand.vmem [shape: bf16[32,32], index: 3, kind: input, shape index: {}]   ;;  %s629_s2 = inlined_call_operand.vmem [shape: f32[1,32], index: 2, kind: input, shape index: {}]   ;;  %s630_s5 = inlined_call_operand.vmem [shape: bf16[32,32], index: 5, kind: input, shape index: {}]   ;;  %s631_s4 = inlined_call_operand.vmem [shape: f32[1,32], index: 4, kind: input, shape index: {}]   ;;  %s632_s7 = inlined_call_operand.vmem [shape: bf16[32,8], index: 7, kind: input, shape index: {}]   ;;  %s633_s6 = inlined_call_operand.vmem [shape: f32[1,32], index: 6, kind: input, shape index: {}]   ;;  %s634_s8 = inlined_call_operand.vmem [shape: f32[1,8], index: 8, kind: input, shape index: {}]   ;;  %s635_s9 = inlined_call_operand.vmem [shape: f32[8,8], index: 9, kind: output, shape index: {}]  }
   0x1   :  { %483 = vmatprep.subr.bf16.mxu0 %v528_v0  ;;  %v515_v1 = vld [vmem:[%s626_s1] sm:$0xff]   ;;  %485 = vmatprep.mubr.msk.bf16.mxu0 %vm529_vm0, %v528_v0  ;;  %v517_v4 = vld [vmem:[%s628_s3 + $0x8] sm:$0xff]   ;;  %vm437_vm3 = vcmask 1040384   ;;  %vm439_vm4 = vcmask 1041408   ;;  %vm441_vm5 = vcmask 1042432   ;;  %vm443_vm6 = vcmask 1043456  }
   0x2   :  { %489 = vmatprep.subr.bf16.mxu1 %v528_v0  ;;  %493 = vmatprep.mubr.msk.bf16.mxu1 %vm529_vm0, %v528_v0  ;;  %v33_v2 = vld [vmem:[%s627_s0] sm:$0xf]  ;;  %v519_v18 = vld [vmem:[%s630_s5 + $0x8] sm:$0xff]   ;;  %vm445_vm7 = vcmask 1044480   ;;  %vm447_vm8 = vcmask 1045504   ;;  %vm449_vm9 = vcmask 1046528  }
   0x3   :  { %484 = vmatpush3.bf16.msra.mxu0 %v515_v1  ;;  %v516_v3 = vld [vmem:[%s628_s3] sm:$0xff]   ;;  %v521_v32 = vld [vmem:[%s632_s7 + $0x8] sm:$0xff]   ;;  %vm451_vm10 = vcmask 64512  }
   0x4   :  { %497 = vmatprep.subr.bf16.mxu0 %v528_v0  ;;  %490 = vmatpush3.bf16.msra.mxu1 %v516_v3  ;;  %v457_v5 = vld [vmem:[%s629_s2] ss:$0 sm:$0xff] }
   0x5   :  { %491 = vmatprep.subr.bf16.mxu1 %v528_v0  ;;  %v518_v17 = vld [vmem:[%s630_s5] sm:$0xff]  }
   0x6   :  { %486 = vmatmul.mubr.msk.bf16.vlgmr.msra.gmra.mrb[0].mxu0 %vm49_vm1, %v33_v2  ;;  %v460_v19 = vld [vmem:[%s631_s4] ss:$0 sm:$0xff] }
   0x7   :  { %501 = vmatprep.mubr.msk.bf16.mxu0 %vm529_vm0, %v528_v0  ;;  %498 = vmatpush3.bf16.msra.mxu0 %v518_v17  ;;  %v520_v31 = vld [vmem:[%s632_s7] sm:$0xff]  }
   0x8   :  { %492 = vmatpush3.bf16.msra.mxu1 %v517_v4  ;;  %499 = vmatprep.subr.bf16.mxu0 %v528_v0  ;;  %v464_v33 = vld [vmem:[%s633_s6] ss:$0 sm:$0xff] }
   0x9   :  { %505 = vmatprep.subr.bf16.mxu1 %v528_v0  ;;  %v468_v45 = vld [vmem:[%s634_s8] ss:$0 sm:$0xff] }
   0xb   :  { %500 = vmatpush3.bf16.msra.mxu0 %v519_v18 }
  0xd9   :  { %v87_v6 = vpop.f32.mrb[0].mxu0 }
  0xda   :  { %v88_v7 = vadd.f32 %v457_v5, %v87_v6  ;;  %v487_v8 = vpop.f32.mrb[1].mxu0 }
  0xdb   :  { %v90_v9 = vpop.f32.mrb[2].mxu0 }
  0xdc   :  { %v94_v10 = vmul.f32 0.70710677, %v88_v7  ;;  %v488_v11 = vpop.f32.mrb[3].mxu0  ;;  %v93_v13 = vmul.f32 0.5, %v88_v7 }
  0xde   :  { %522 = verf.f32 %v94_v10 }
  0xe8   :  { %v523_v12 = vpop.eup %522 }
  0xe9   :  { %v96_v14 = vadd.f32 1.0, %v523_v12 }
  0xeb   :  { %v97_v15 = vmul.f32 %v96_v14, %v93_v13 }
  0xed   :  { %v102_v16 = vpack.c.bf16 %v97_v15, %v97_v15 }
  0xef   :  { %494 = vmatmul.mubr.msk.bf16.vlgmr.msra.gmra.mrb[0].mxu1 %vm122_vm2, %v102_v16 }
  0xf0   :  { %509 = vmatprep.mubr.msk.bf16.mxu1 %vm529_vm0, %v528_v0  ;;  %506 = vmatpush3.bf16.msra.mxu1 %v520_v31 }
  0xf1   :  { %507 = vmatprep.subr.bf16.mxu1 %v528_v0 }
  0xf4   :  { %508 = vmatpush3.bf16.msra.mxu1 %v521_v32 }
 0x1c2   :  { %v160_v20 = vpop.f32.mrb[0].mxu1 }
 0x1c3   :  { %v161_v21 = vadd.f32 %v460_v19, %v160_v20  ;;  %v495_v22 = vpop.f32.mrb[1].mxu1 }
 0x1c4   :  { %v163_v23 = vpop.f32.mrb[2].mxu1 }
 0x1c5   :  { %v167_v24 = vmul.f32 0.70710677, %v161_v21  ;;  %v496_v25 = vpop.f32.mrb[3].mxu1  ;;  %v166_v27 = vmul.f32 0.5, %v161_v21 }
 0x1c7   :  { %524 = verf.f32 %v167_v24 }
 0x1d1   :  { %v525_v26 = vpop.eup %524 }
 0x1d2   :  { %v169_v28 = vadd.f32 1.0, %v525_v26 }
 0x1d4   :  { %v170_v29 = vmul.f32 %v169_v28, %v166_v27 }
 0x1d6   :  { %v175_v30 = vpack.c.bf16 %v170_v29, %v170_v29 }
 0x1d8   :  { %502 = vmatmul.mubr.msk.bf16.vlgmr.msra.gmra.mrb[4].mxu0 %vm122_vm2, %v175_v30 }
 0x2ab   :  { %v232_v34 = vpop.f32.mrb[4].mxu0 }
 0x2ac   :  { %v233_v35 = vadd.f32 %v464_v33, %v232_v34  ;;  %v503_v36 = vpop.f32.mrb[5].mxu0 }
 0x2ad   :  { %v235_v37 = vpop.f32.mrb[6].mxu0 }
 0x2ae   :  { %v239_v38 = vmul.f32 0.70710677, %v233_v35  ;;  %v504_v39 = vpop.f32.mrb[7].mxu0  ;;  %v238_v41 = vmul.f32 0.5, %v233_v35 }
 0x2b0   :  { %526 = verf.f32 %v239_v38 }
 0x2ba   :  { %v527_v40 = vpop.eup %526 }
 0x2bb   :  { %v241_v42 = vadd.f32 1.0, %v527_v40 }
 0x2bd   :  { %v242_v43 = vmul.f32 %v241_v42, %v238_v41 }
 0x2bf   :  { %v247_v44 = vpack.c.bf16 %v242_v43, %v242_v43 }
 0x2c1   :  { %510 = vmatmul.mubr.msk.bf16.vlgmr.msra.gmra.mrb[4].mxu1 %vm122_vm2, %v247_v44 }
 0x394   :  { %v304_v46 = vpop.f32.mrb[4].mxu1 }
 0x395   :  { %v511_v47 = vpop.f32.mrb[5].mxu1  ;;  %v305_v48 = vadd.f32 %v468_v45, %v304_v46 }
 0x396   :  { %v307_v49 = vpop.f32.mrb[6].mxu1 }
 0x397   :  { %310 = vxpose.xlu0.b32.start.end [1/1] (short) (narrow) %v305_v48, 8  ;;  %v512_v50 = vpop.f32.mrb[7].mxu1 }
 0x417   :  { %v326_v51 = vpop.trf.xlu0 }
 0x418   :  { %v343_v52 = vrot.slane %v326_v51, 1 }
 0x41a   :  { %v345_v53 = vmin.f32 %v326_v51, %v343_v52  ;;  %v346_v54 = vmax.f32 %v326_v51, %v343_v52 }
 0x41c   :  { %v348_v55 = vrot.slane %v345_v53, 2  ;;  %v360_v58 = vrot.slane %v346_v54, 2 }
 0x41e   :  { %v350_v56 = vmin.f32 %v346_v54, %v348_v55  ;;  %v351_v57 = vmax.f32 %v346_v54, %v348_v55 }
 0x420   :  { %v355_v59 = vrot.slane %v350_v56, 2  ;;  %v362_v60 = vmin.f32 %v351_v57, %v360_v58  ;;  %v363_v61 = vmax.f32 %v351_v57, %v360_v58  ;;  %v353_v62 = vmax.f32 %v345_v53, %v350_v56 }
 0x421   :  { %v352_v7 = vmin.f32 %v345_v53, %v350_v56 }
 0x422   :  { %v357_v63 = vmin.f32 %v351_v57, %v355_v59  ;;  %v358_v0 = vmax.f32 %v351_v57, %v355_v59  ;;  %v372_v1 = vrot.slane %v362_v60, 2  ;;  %v386_v6 = vrot.slane %v363_v61, 2 }
 0x424   :  { %v364_v2 = vmin.f32 %v353_v62, %v357_v63  ;;  %v367_v3 = vrot.slane %v357_v63, 2  ;;  %v374_v4 = vmin.f32 %v358_v0, %v372_v1  ;;  %v375_v5 = vmax.f32 %v358_v0, %v372_v1 }
 0x425   :  { %v365_v8 = vmax.f32 %v353_v62, %v357_v63 }
 0x426   :  { %v369_v9 = vmin.f32 %v358_v0, %v367_v3  ;;  %v370_v10 = vmax.f32 %v358_v0, %v367_v3  ;;  %v381_v11 = vrot.slane %v374_v4, 2  ;;  %v388_v12 = vmin.f32 %v375_v5, %v386_v6 }
 0x427   :  { %v377_v13 = vmax.f32 %v352_v7, %v364_v2  ;;  %v389_v16 = vmax.f32 %v375_v5, %v386_v6  ;;  %v376_v20 = vmin.f32 %v352_v7, %v364_v2 }
 0x428   :  { %v378_v14 = vmin.f32 %v365_v8, %v369_v9  ;;  %v379_v15 = vmax.f32 %v365_v8, %v369_v9  ;;  %v383_v17 = vmin.f32 %v370_v10, %v381_v11  ;;  %v384_v18 = vmax.f32 %v370_v10, %v381_v11 }
 0x429   :  { %v395_v19 = vrot.slane %v388_v12, 2  ;;  %v406_v28 = vrot.slane %v389_v16, 2 }
 0x42a   :  { %v390_v21 = vmin.f32 %v377_v13, %v378_v14  ;;  %v391_v22 = vmax.f32 %v377_v13, %v378_v14  ;;  %v392_v23 = vmin.f32 %v379_v15, %v383_v17  ;;  %v393_v24 = vmax.f32 %v379_v15, %v383_v17 }
 0x42b   :  { %v397_v25 = vmin.f32 %v384_v18, %v395_v19  ;;  %v398_v26 = vmax.f32 %v384_v18, %v395_v19 }
 0x42c   :  { %v400_v27 = vmax.f32 %v376_v20, %v390_v21  ;;  %v401_v29 = vmin.f32 %v391_v22, %v392_v23  ;;  %v402_v30 = vmax.f32 %v391_v22, %v392_v23  ;;  %v399_v38 = vmin.f32 %v376_v20, %v390_v21 }
 0x42d   :  { %v403_v31 = vmin.f32 %v393_v24, %v397_v25  ;;  %v404_v32 = vmax.f32 %v393_v24, %v397_v25  ;;  %v408_v33 = vmin.f32 %v398_v26, %v406_v28  ;;  %v409_v43 = vmax.f32 %v398_v26, %v406_v28 }
 0x42e   :  { %v410_v34 = vmin.f32 %v400_v27, %v401_v29  ;;  %v411_v35 = vmax.f32 %v400_v27, %v401_v29 }
 0x42f   :  { %v412_v36 = vmin.f32 %v402_v30, %v403_v31  ;;  %v413_v37 = vmax.f32 %v402_v30, %v403_v31  ;;  %v414_v39 = vmin.f32 %v404_v32, %v408_v33  ;;  %v415_v42 = vmax.f32 %v404_v32, %v408_v33 }
 0x430   :  { %v417_v40 = vrot.slane %v410_v34, 7  ;;  %v420_v41 = vrot.slane %v411_v35, 6  ;;  %v435_v52 = vrot.slane %v409_v43, 1 }
 0x431   :  { %v423_v44 = vrot.slane %v412_v36, 5  ;;  %v426_v46 = vrot.slane %v413_v37, 4  ;;  %v429_v48 = vrot.slane %v414_v39, 3  ;;  %v432_v50 = vrot.slane %v415_v42, 2 }
 0x432   :  { %v438_v45 = vsel %vm437_vm3, %v399_v38, %v417_v40 }
 0x433   :  { %v440_v47 = vsel %vm439_vm4, %v438_v45, %v420_v41 }
 0x434   :  { %v442_v49 = vsel %vm441_vm5, %v440_v47, %v423_v44 }
 0x435   :  { %v444_v51 = vsel %vm443_vm6, %v442_v49, %v426_v46 }
 0x436   :  { %v446_v53 = vsel %vm445_vm7, %v444_v51, %v429_v48 }
 0x437   :  { %v448_v54 = vsel %vm447_vm8, %v446_v53, %v432_v50 }
 0x438   :  { %v450_v55 = vsel %vm449_vm9, %v448_v54, %v435_v52 }
 0x439   :  { %452 = vst.msk [vmem:[%s635_s9] sm:$0xff] %vm451_vm10, %v450_v55 }

</bundles_post_ra>
